<compile_context>
chip_gen: v7x
topology: tpu7x:2x2x1
jax: 0.10.0
libtpu: 0.0.40
codegen_flags: <defaults>
</compile_context>

<pallas_src>
from typing import NamedTuple, Tuple

import numpy as np
import jax
import jax.numpy as jnp
from jax.experimental import pallas as pl
from jax.experimental.pallas import tpu as pltpu

_LANE = 128


def _round_up(v, m):
    return (v + m - 1) // m * m


def _pad2d(a, rows, cols):
    r, c = a.shape
    if r == rows and c == cols:
        return a
    return jnp.pad(a, ((0, rows - r), (0, cols - c)))


# ----------------------------------------------------------------------------
# Kernels
# ----------------------------------------------------------------------------
def _decoder_kernel(x_ref, wfc_ref, bfc_ref, w0_ref, b0_ref, w2_ref, b2_ref, o_ref):
    """fc(+ReLU) -> conv0(+ReLU) -> conv2 for one (row-tile, spatial-position) grid cell."""
    cd = w0_ref.dtype  # compute dtype of the matmul inputs (f32 or bf16)
    a = jnp.dot(x_ref[...], wfc_ref[0], preferred_element_type=jnp.float32) + bfc_ref[0]
    a = jnp.maximum(a, 0.0).astype(cd)
    a = jnp.dot(a, w0_ref[...], preferred_element_type=jnp.float32) + b0_ref[...]
    a = jnp.maximum(a, 0.0).astype(cd)
    a = jnp.dot(a, w2_ref[...], preferred_element_type=jnp.float32) + b2_ref[...]
    o_ref[0] = a.astype(o_ref.dtype)


def _decoder_cls_kernel(x_ref, wfc0_ref, bfc0_ref, w0_ref, b0_ref, w2_ref, b2_ref,
                        sel_ref, bcls_ref, o_ref):
    """Same chain restricted to spatial position (0,0) + fused ReLU/class-head matmul."""
    cd = w0_ref.dtype
    a = jnp.dot(x_ref[...], wfc0_ref[...], preferred_element_type=jnp.float32) + bfc0_ref[...]
    a = jnp.maximum(a, 0.0).astype(cd)
    a = jnp.dot(a, w0_ref[...], preferred_element_type=jnp.float32) + b0_ref[...]
    a = jnp.maximum(a, 0.0).astype(cd)
    a = jnp.dot(a, w2_ref[...], preferred_element_type=jnp.float32) + b2_ref[...]
    a = jnp.maximum(a, 0.0).astype(cd)
    a = jnp.dot(a, sel_ref[...], preferred_element_type=jnp.float32) + bcls_ref[...]
    o_ref[...] = a.astype(o_ref.dtype)


# ----------------------------------------------------------------------------
# Parameters (deterministic; shapes mirror the nn.Module __init__)
# ----------------------------------------------------------------------------
class DecoderConfig(NamedTuple):
    in_features: int
    hid: Tuple[int, int]
    out_shape: Tuple[int, int, int, int]
    num_classes: int


def init_conv_decoder(key, in_features, hid, out_shape, num_classes):
    assert len(hid) == 2, "this implementation mirrors the default 2-layer hid"
    ch_prod = out_shape[0] * out_shape[1]
    spatial_prod = out_shape[2] * out_shape[3]
    out_features = hid[0] * spatial_prod
    ks = jax.random.split(key, 8)
    scale = 0.1
    cfg = DecoderConfig(in_features, tuple(hid), tuple(out_shape), num_classes)
    weights = dict(
        fc_w=scale * jax.random.normal(ks[0], (out_features, in_features), jnp.float32),
        fc_b=scale * jax.random.normal(ks[1], (out_features,), jnp.float32),
        conv0_w=scale * jax.random.normal(ks[2], (hid[1], hid[0], 1, 1), jnp.float32),
        conv0_b=scale * jax.random.normal(ks[3], (hid[1],), jnp.float32),
        conv2_w=scale * jax.random.normal(ks[4], (ch_prod, hid[1], 1, 1), jnp.float32),
        conv2_b=scale * jax.random.normal(ks[5], (ch_prod,), jnp.float32),
        cls_w=scale * jax.random.normal(ks[6], (num_classes, out_shape[0], 1, 1), jnp.float32),
        cls_b=scale * jax.random.normal(ks[7], (num_classes,), jnp.float32),
    )
    return cfg, weights


# ----------------------------------------------------------------------------
# One-time weight preparation (cached by the caller per (weights, max_shape, class_pred))
# ----------------------------------------------------------------------------
class DecoderMeta(NamedTuple):
    H: int
    W: int
    n_out: int
    group: int
    n_keep: int
    num_classes: int
    class_pred: bool
    tile_hw: bool


class PreparedDecoder(NamedTuple):
    meta: DecoderMeta
    ops: Tuple[jax.Array, ...]


def prepare_conv_decoder(cfg, w, max_shape=(1, 1, 1, 1), class_pred=False,
                         compute_dtype=jnp.float32):
    os0, os1, os2, os3 = cfg.out_shape
    hid0, hid1 = cfg.hid
    nc = cfg.num_classes
    F = cfg.in_features

    # unified fc row selection (== cols_1d[:, :H, :W] of the original module)
    H = min(os2, max_shape[2])
    Wd = min(os3, max_shape[3])
    HW = H * Wd
    fc_w = w['fc_w'].reshape(hid0, os2, os3, F)[:, :H, :Wd].reshape(hid0, HW, F)
    fc_b = w['fc_b'].reshape(hid0, os2, os3)[:, :H, :Wd].reshape(hid0, HW)
    wfc = jnp.transpose(fc_w, (1, 2, 0))          # (HW, F, hid0): per-spatial fc weight
    bfc = fc_b.T                                  # (HW, hid0)

    w0 = w['conv0_w'].reshape(hid1, hid0).T       # (hid0, hid1)
    b0 = w['conv0_b']
    w2_full = w['conv2_w'].reshape(os0 * os1, hid1)
    b2_full = w['conv2_b']

    # conv2 channel selection (static replica of the forward's branch logic)
    branch1 = (max_shape[1] <= os1 // 2) or (max_shape[0] < os0 and not class_pred)
    if branch1:
        if max_shape[1] < os1 and max_shape[1] % 3 == 0:
            n_in = max_shape[1] // 3 * 4
        else:
            n_in = min(max_shape[1], os1)
        n_out = os0 if class_pred else min(os0, max_shape[0])
        ind = np.arange(os0 * os1)[: n_out * os1]
        if n_in < os1:
            ind = ind.reshape(-1, n_in)[:: os1 // n_in].reshape(-1)
        w2, b2 = w2_full[ind], b2_full[ind]
        n_keep, group = min(os1, max_shape[1]), n_in
    else:
        w2, b2 = w2_full, b2_full
        n_out, group, n_keep = os0, os1, os1

    k_chan = n_out * group
    c0p = _round_up(hid0, _LANE)
    c1p = _round_up(hid1, _LANE)
    kcp = _round_up(k_chan, _LANE)

    w0p = _pad2d(w0, c0p, c1p).astype(compute_dtype)
    b0p = _pad2d(b0.reshape(1, hid1), 1, c1p).astype(jnp.float32)
    w2p = _pad2d(w2.T, c1p, kcp).astype(compute_dtype)
    b2p = _pad2d(b2.reshape(1, k_chan), 1, kcp).astype(jnp.float32)

    tile_hw = bool(branch1 and (min(max_shape[2], max_shape[3]) > min(H, Wd)))

    if class_pred:
        # only spatial position (0,0) survives the class head -> keep just the p=0 fc slice
        wfc0 = _pad2d(wfc[0], F, c0p).astype(compute_dtype)
        bfc0 = _pad2d(bfc[0].reshape(1, hid0), 1, c0p).astype(jnp.float32)
        wc = w['cls_w'].reshape(nc, os0)
        bc = w['cls_b']
        # sel[o0*group + j, cls*n_keep + j] = wc[cls, o0]  (j < n_keep), zero elsewhere
        sel = jnp.einsum('co,jk->ojck', wc, jnp.eye(group, n_keep, dtype=wc.dtype))
        sel = sel.reshape(n_out * group, nc * n_keep)
        outcp = _round_up(nc * n_keep, _LANE)
        selp = _pad2d(sel, kcp, outcp).astype(compute_dtype)
        bclsp = _pad2d(jnp.repeat(bc, n_keep).reshape(1, nc * n_keep), 1, outcp
                       ).astype(jnp.float32)
        ops = (wfc0, bfc0, w0p, b0p, w2p, b2p, selp, bclsp)
    else:
        wfcp = jnp.pad(wfc, ((0, 0), (0, 0), (0, c0p - hid0))).astype(compute_dtype)
        bfcp = jnp.pad(bfc, ((0, 0), (0, c0p - hid0))).reshape(HW, 1, c0p).astype(jnp.float32)
        ops = (wfcp, bfcp, w0p, b0p, w2p, b2p)

    meta = DecoderMeta(H=H, W=Wd, n_out=n_out, group=group, n_keep=n_keep,
                       num_classes=nc, class_pred=bool(class_pred), tile_hw=tile_hw)
    return PreparedDecoder(meta=meta, ops=tuple(ops))


# ----------------------------------------------------------------------------
# Jittable apply: pallas_call + cheap layout glue (meta is static)
# ----------------------------------------------------------------------------
def conv_decoder_apply(meta, ops, x):
    N, F = x.shape
    H, W = meta.H, meta.W
    HW = H * W
    n_out, group, n_keep = meta.n_out, meta.group, meta.n_keep
    k_chan = n_out * group
    cd = ops[0].dtype

    tm = min(_round_up(N, 16), 256)            # row tile (sublane-friendly for f32 & bf16)
    m_pad = _round_up(N, tm)
    row_tiles = m_pad // tm
    x_pad = _pad2d(x, m_pad, F).astype(cd)

    def _bytes(*arrs):
        return sum(int(a.size) * a.dtype.itemsize for a in arrs)

    if meta.class_pred:
        wfc0, bfc0, w0, b0, w2, b2, sel, bcls = ops
        c0p, c1p, kcp, outcp = wfc0.shape[1], w0.shape[1], w2.shape[1], sel.shape[1]
        grid = (row_tiles,)
        in_specs = ([pl.BlockSpec((tm, F), lambda i: (i, 0))]
                    + [pl.BlockSpec(memory_space=pltpu.MemorySpace.VMEM)] * len(ops))
        out_specs = pl.BlockSpec((tm, outcp), lambda i: (i, 0))
        out_sds = jax.ShapeDtypeStruct((m_pad, outcp), jnp.float32)
        kernel = _decoder_cls_kernel
        dim_sem = ("parallel",)
        flops = 2 * m_pad * (F * c0p + c0p * c1p + c1p * kcp + kcp * outcp)
        block_bytes = tm * F * x_pad.dtype.itemsize + tm * outcp * 4
        resident_bytes = _bytes(*ops)
    else:
        wfc, bfc, w0, b0, w2, b2 = ops
        c0p, c1p, kcp = wfc.shape[2], w0.shape[1], w2.shape[1]
        grid = (row_tiles, HW)
        in_specs = ([pl.BlockSpec((tm, F), lambda i, p: (i, 0)),
                     pl.BlockSpec((1, F, c0p), lambda i, p: (p, 0, 0)),
                     pl.BlockSpec((1, 1, c0p), lambda i, p: (p, 0, 0))]
                    + [pl.BlockSpec(memory_space=pltpu.MemorySpace.VMEM)] * 4)
        out_specs = pl.BlockSpec((1, tm, kcp), lambda i, p: (p, i, 0))
        out_sds = jax.ShapeDtypeStruct((HW, m_pad, kcp), jnp.float32)
        kernel = _decoder_kernel
        dim_sem = ("parallel", "parallel")
        flops = 2 * m_pad * HW * (F * c0p + c0p * c1p + c1p * kcp)
        block_bytes = (tm * F * x_pad.dtype.itemsize + F * c0p * wfc.dtype.itemsize
                       + c0p * 4 + tm * kcp * 4)
        resident_bytes = _bytes(w0, b0, w2, b2)

    bytes_accessed = _bytes(x_pad, *ops) + int(np.prod(out_sds.shape)) * 4
    # Only override the scoped-VMEM limit when the footprint would exceed v5e's 16 MiB default.
    need = 2 * block_bytes + resident_bytes + (2 << 20)
    vmem_limit = None if need <= (16 << 20) else int(min(2 * need, 112 << 20))

    y = pl.pallas_call(
        kernel,
        out_shape=out_sds,
        grid=grid,
        in_specs=in_specs,
        out_specs=out_specs,
        compiler_params=pltpu.CompilerParams(
            dimension_semantics=dim_sem, vmem_limit_bytes=vmem_limit),
        cost_estimate=pl.CostEstimate(flops=int(flops), transcendentals=0,
                                      bytes_accessed=int(bytes_accessed)),
    )(x_pad, *ops)

    if meta.class_pred:
        d_out = meta.num_classes * n_keep
        return y[:N, :d_out].reshape(N, meta.num_classes, n_keep)

    y = jnp.transpose(y[:, :N, :k_chan], (1, 2, 0))          # (N, k_chan, HW)
    y = y.reshape(N, n_out, group, H, W)[:, :, :n_keep]
    if meta.tile_hw:
        y = jnp.tile(y, (1, 1, 1, 2, 2))
    return y


def conv_decoder_forward(cfg, weights, x, max_shape=(1, 1, 1, 1), class_pred=False,
                         compute_dtype=jnp.float32):
    """Convenience one-shot path; for repeated calls use prepare_conv_decoder once +
    a jitted conv_decoder_apply (the weight prep is the expensive part at small N)."""
    prep = prepare_conv_decoder(cfg, weights, max_shape=max_shape, class_pred=class_pred,
                                compute_dtype=compute_dtype)
    return conv_decoder_apply(prep.meta, prep.ops, x)


# ----------------------------------------------------------------------------
# Pure-JAX reference (direct transcription of the PyTorch forward) for checking
# ----------------------------------------------------------------------------
def _reference_forward(cfg, w, x, max_shape=(1, 1, 1, 1), class_pred=False):
    os0, os1, os2, os3 = cfg.out_shape
    hid0, hid1 = cfg.hid
    N = x.shape[0]
    relu = lambda t: jnp.maximum(t, 0.0)
    hp = jax.lax.Precision.HIGHEST

    def conv1x1(t, cw, cb):                                  # t NCHW, cw (Cout, Cin, 1, 1)
        return (jnp.einsum('nchw,oc->nohw', t, cw.reshape(cw.shape[0], cw.shape[1]),
                           precision=hp) + cb.reshape(1, -1, 1, 1))

    cols_1d = np.arange(hid0 * os2 * os3).reshape(hid0, os2, os3)
    cols_4d = np.arange(os0 * os1)

    if sum(max_shape[2:]) < (os2 + os3):
        ind = cols_1d[:, :max_shape[2], :max_shape[3]].flatten()
        t = relu(jnp.dot(x, w['fc_w'][ind].T, precision=hp) + w['fc_b'][ind]
                 ).reshape(N, -1, max_shape[2], max_shape[3])
    else:
        t = relu(jnp.dot(x, w['fc_w'].T, precision=hp) + w['fc_b']
                 ).reshape(N, -1, os2, os3)[:, :, :max_shape[2], :max_shape[3]]

    out_shape = (os0, os1, min(os2, max_shape[2]), min(os3, max_shape[3]))
    if max_shape[1] <= out_shape[1] // 2 or (max_shape[0] < out_shape[0] and not class_pred):
        t = relu(conv1x1(t, w['conv0_w'], w['conv0_b']))
        if max_shape[1] < out_shape[1] and max_shape[1] % 3 == 0:
            n_in = max_shape[1] // 3 * 4
        else:
            n_in = min(max_shape[1], out_shape[1])
        n_out = out_shape[0] if class_pred else min(out_shape[0], max_shape[0])
        ind = cols_4d[: n_out * out_shape[1]]
        if n_in < out_shape[1]:
            ind = ind.reshape(-1, n_in)[:: out_shape[1] // n_in].flatten()
        t = conv1x1(t, w['conv2_w'][ind], w['conv2_b'][ind])
        t = t.reshape(N, n_out, n_in, out_shape[2], out_shape[3])[:, :, :min(out_shape[1], max_shape[1])]
        if min(max_shape[2:]) > min(out_shape[2:]):
            t = jnp.tile(t, (1, 1, 1, 2, 2))
    else:
        t = relu(conv1x1(t, w['conv0_w'], w['conv0_b']))
        t = conv1x1(t, w['conv2_w'], w['conv2_b'])
        t = t.reshape(N, out_shape[0], -1, out_shape[2], out_shape[3])

    if class_pred:
        ts = relu(t[:, :, :, :, 0])
        ts = (jnp.einsum('nchw,oc->nohw', ts, w['cls_w'].reshape(cfg.num_classes, os0),
                         precision=hp) + w['cls_b'].reshape(1, -1, 1, 1))
        t = ts[:, :, :, 0]
    return t


# ----------------------------------------------------------------------------
if __name__ == "__main__":
    key = jax.random.PRNGKey(0)
    k_param, k_x = jax.random.split(key)

    in_features = 32
    hid = (16, 32)
    out_shape = (8, 8, 3, 3)      # (C_out, C_in, H, W) of the predicted conv weight
    num_classes = 10
    N = 2

    cfg, weights = init_conv_decoder(k_param, in_features, hid, out_shape, num_classes)
    x = jax.random.normal(k_x, (N, in_features), jnp.float32)

    apply_jit = jax.jit(conv_decoder_apply, static_argnums=(0,))

    # Weight prep (selection / transposes / padding / class-head selector) runs ONCE per
    # configuration; the jitted apply reuses the prepared operands on every call.
    configs = [
        ((1, 1, 1, 1), False, jnp.float32),
        (out_shape, False, jnp.float32),
        (out_shape, True, jnp.float32),
        ((1, 1, 1, 1), True, jnp.float32),
        (out_shape, False, jnp.bfloat16),   # bf16 MXU inputs (recommended on v6e/v7x)
    ]
    results = []
    for ms, cp, cdt in configs:
        prep = prepare_conv_decoder(cfg, weights, max_shape=ms, class_pred=cp,
                                    compute_dtype=cdt)
        y = apply_jit(prep.meta, prep.ops, x)
        results.append((y, ms, cp, cdt))
    jax.block_until_ready([r[0] for r in results])

    assert results[0][0].shape == (N, 1, 1, 1, 1), results[0][0].shape
    assert results[1][0].shape == (N, *out_shape), results[1][0].shape
    assert results[2][0].shape == (N, num_classes, out_shape[1]), results[2][0].shape
    assert results[3][0].shape == (N, num_classes, 1), results[3][0].shape
    assert results[4][0].shape == (N, *out_shape), results[4][0].shape

    # numerical check vs. a plain-JAX transcription of the PyTorch forward
    for y, ms, cp, cdt in results:
        ref = _reference_forward(cfg, weights, x, max_shape=ms, class_pred=cp)
        if cdt == jnp.bfloat16:
            rtol, atol = 4e-2, 1.5e-2   # bf16 matmul inputs, f32 accumulation
        else:
            rtol, atol = 2e-2, 5e-3     # f32 kernel vs highest-precision XLA reference
        np.testing.assert_allclose(np.asarray(y, dtype=np.float32), np.asarray(ref),
                                   rtol=rtol, atol=atol)

    print("KERNEL_OK")
</pallas_src>

<mosaic_0001>
module attributes {stable_mosaic.version = 11 : i64} {
  func.func @_decoder_kernel(%arg0: i32, %arg1: i32, %arg2: memref<16x32xf32, #tpu.memory_space<vmem>>, %arg3: memref<1x32x128xf32, #tpu.memory_space<vmem>>, %arg4: memref<1x1x128xf32, #tpu.memory_space<vmem>>, %arg5: memref<128x128xf32, #tpu.memory_space<vmem>>, %arg6: memref<1x128xf32, #tpu.memory_space<vmem>>, %arg7: memref<128x128xf32, #tpu.memory_space<vmem>>, %arg8: memref<1x128xf32, #tpu.memory_space<vmem>>, %arg9: memref<1x16x128xf32, #tpu.memory_space<vmem>>) attributes {dimension_semantics = [#tpu.dimension_semantics<parallel>, #tpu.dimension_semantics<parallel>], iteration_bounds = array<i64: 1, 1>, scalar_prefetch = 0 : i64, scratch_operands = 0 : i64, tpu.core_type = #tpu.core_type<tc>, window_params = [{transform_indices = @transform_0, window_bounds = array<i64: 16, 32>}, {transform_indices = @transform_1, window_bounds = array<i64: 1, 32, 128>}, {transform_indices = @transform_2, window_bounds = array<i64: 1, 1, 128>}, {pipeline_mode = #tpu.pipeline_mode<synchronous>, transform_indices = @transform_3, window_bounds = array<i64: 128, 128>}, {pipeline_mode = #tpu.pipeline_mode<synchronous>, transform_indices = @transform_4, window_bounds = array<i64: 1, 128>}, {pipeline_mode = #tpu.pipeline_mode<synchronous>, transform_indices = @transform_5, window_bounds = array<i64: 128, 128>}, {pipeline_mode = #tpu.pipeline_mode<synchronous>, transform_indices = @transform_6, window_bounds = array<i64: 1, 128>}, {transform_indices = @transform_7, window_bounds = array<i64: 1, 16, 128>}]} {
    %c0 = arith.constant 0 : index
    %c0_0 = arith.constant 0 : index
    %0 = vector.load %arg2[%c0, %c0_0] : memref<16x32xf32, #tpu.memory_space<vmem>>, vector<16x32xf32>
    %c0_1 = arith.constant 0 : index
    %c0_2 = arith.constant 0 : index
    %c0_3 = arith.constant 0 : index
    %1 = vector.load %arg3[%c0_1, %c0_2, %c0_3] : memref<1x32x128xf32, #tpu.memory_space<vmem>>, vector<1x32x128xf32>
    %2 = vector.shape_cast %1 : vector<1x32x128xf32> to vector<32x128xf32>
    %cst = arith.constant dense<0.000000e+00> : vector<16x128xf32>
    %3 = tpu.matmul %0, %2, %cst {dimension_numbers = #tpu.dot_dimension_numbers<[1], [0], [0], [1], [0, 0, 1, 1], [], []>} : vector<16x32xf32>, vector<32x128xf32>, vector<16x128xf32> -> vector<16x128xf32>
    %c0_4 = arith.constant 0 : index
    %c0_5 = arith.constant 0 : index
    %c0_6 = arith.constant 0 : index
    %4 = vector.load %arg4[%c0_4, %c0_5, %c0_6] : memref<1x1x128xf32, #tpu.memory_space<vmem>>, vector<1x1x128xf32>
    %5 = vector.shape_cast %4 : vector<1x1x128xf32> to vector<1x128xf32>
    %6 = vector.broadcast %5 : vector<1x128xf32> to vector<16x128xf32>
    %7 = arith.addf %3, %6 : vector<16x128xf32>
    %cst_7 = arith.constant 0.000000e+00 : f32
    %8 = vector.broadcast %cst_7 : f32 to vector<16x128xf32>
    %9 = arith.maximumf %7, %8 : vector<16x128xf32>
    %c0_8 = arith.constant 0 : index
    %c0_9 = arith.constant 0 : index
    %10 = vector.load %arg5[%c0_8, %c0_9] : memref<128x128xf32, #tpu.memory_space<vmem>>, vector<128x128xf32>
    %cst_10 = arith.constant dense<0.000000e+00> : vector<16x128xf32>
    %11 = tpu.matmul %9, %10, %cst_10 {dimension_numbers = #tpu.dot_dimension_numbers<[1], [0], [0], [1], [0, 0, 1, 1], [], []>} : vector<16x128xf32>, vector<128x128xf32>, vector<16x128xf32> -> vector<16x128xf32>
    %c0_11 = arith.constant 0 : index
    %c0_12 = arith.constant 0 : index
    %12 = vector.load %arg6[%c0_11, %c0_12] : memref<1x128xf32, #tpu.memory_space<vmem>>, vector<1x128xf32>
    %13 = vector.broadcast %12 : vector<1x128xf32> to vector<16x128xf32>
    %14 = arith.addf %11, %13 : vector<16x128xf32>
    %cst_13 = arith.constant 0.000000e+00 : f32
    %15 = vector.broadcast %cst_13 : f32 to vector<16x128xf32>
    %16 = arith.maximumf %14, %15 : vector<16x128xf32>
    %c0_14 = arith.constant 0 : index
    %c0_15 = arith.constant 0 : index
    %17 = vector.load %arg7[%c0_14, %c0_15] : memref<128x128xf32, #tpu.memory_space<vmem>>, vector<128x128xf32>
    %cst_16 = arith.constant dense<0.000000e+00> : vector<16x128xf32>
    %18 = tpu.matmul %16, %17, %cst_16 {dimension_numbers = #tpu.dot_dimension_numbers<[1], [0], [0], [1], [0, 0, 1, 1], [], []>} : vector<16x128xf32>, vector<128x128xf32>, vector<16x128xf32> -> vector<16x128xf32>
    %c0_17 = arith.constant 0 : index
    %c0_18 = arith.constant 0 : index
    %19 = vector.load %arg8[%c0_17, %c0_18] : memref<1x128xf32, #tpu.memory_space<vmem>>, vector<1x128xf32>
    %20 = vector.broadcast %19 : vector<1x128xf32> to vector<16x128xf32>
    %21 = arith.addf %18, %20 : vector<16x128xf32>
    %c0_19 = arith.constant 0 : index
    %c0_20 = arith.constant 0 : index
    %c0_21 = arith.constant 0 : index
    %22 = vector.load %arg9[%c0_19, %c0_20, %c0_21] : memref<1x16x128xf32, #tpu.memory_space<vmem>>, vector<1x16x128xf32>
    %23 = vector.shape_cast %22 : vector<1x16x128xf32> to vector<16x128xf32>
    %24 = vector.shape_cast %21 : vector<16x128xf32> to vector<1x16x128xf32>
    tpu.vector_store %arg9[%c0_19, %c0_20, %c0_21], %24 {strides = array<i32>} : memref<1x16x128xf32, #tpu.memory_space<vmem>>, vector<1x16x128xf32>,
    return
  }
  func.func @transform_0(%arg0: i32, %arg1: i32) -> (i32, i32) {
    %c0_i32 = arith.constant 0 : i32
    %c0_i32_0 = arith.constant 0 : i32
    return %arg0, %c0_i32 : i32, i32
  }
  func.func @transform_1(%arg0: i32, %arg1: i32) -> (i32, i32, i32) {
    %c0_i32 = arith.constant 0 : i32
    %c0_i32_0 = arith.constant 0 : i32
    %c0_i32_1 = arith.constant 0 : i32
    return %arg1, %c0_i32, %c0_i32_0 : i32, i32, i32
  }
  func.func @transform_2(%arg0: i32, %arg1: i32) -> (i32, i32, i32) {
    %c0_i32 = arith.constant 0 : i32
    %c0_i32_0 = arith.constant 0 : i32
    %c0_i32_1 = arith.constant 0 : i32
    return %arg1, %c0_i32, %c0_i32_0 : i32, i32, i32
  }
  func.func @transform_3(%arg0: i32, %arg1: i32) -> (i32, i32) {
    %c0_i32 = arith.constant 0 : i32
    %c0_i32_0 = arith.constant 0 : i32
    %c0_i32_1 = arith.constant 0 : i32
    return %c0_i32, %c0_i32_0 : i32, i32
  }
  func.func @transform_4(%arg0: i32, %arg1: i32) -> (i32, i32) {
    %c0_i32 = arith.constant 0 : i32
    %c0_i32_0 = arith.constant 0 : i32
    %c0_i32_1 = arith.constant 0 : i32
    return %c0_i32, %c0_i32_0 : i32, i32
  }
  func.func @transform_5(%arg0: i32, %arg1: i32) -> (i32, i32) {
    %c0_i32 = arith.constant 0 : i32
    %c0_i32_0 = arith.constant 0 : i32
    %c0_i32_1 = arith.constant 0 : i32
    return %c0_i32, %c0_i32_0 : i32, i32
  }
  func.func @transform_6(%arg0: i32, %arg1: i32) -> (i32, i32) {
    %c0_i32 = arith.constant 0 : i32
    %c0_i32_0 = arith.constant 0 : i32
    %c0_i32_1 = arith.constant 0 : i32
    return %c0_i32, %c0_i32_0 : i32, i32
  }
  func.func @transform_7(%arg0: i32, %arg1: i32) -> (i32, i32, i32) {
    %c0_i32 = arith.constant 0 : i32
    %c0_i32_0 = arith.constant 0 : i32
    return %arg1, %arg0, %c0_i32 : i32, i32, i32
  }
}

</mosaic_0001>

<bundles_post_ra>
// kernel: conv_decoder_apply.1
= control target key start
LH: loop header
LB: loop body
LE: loop exit
PB: predicated region body
PF: predicated region fallthrough
CT: control target
= control target key end

     0   :  { %12 = vsyncpa [#allocation3], 0  ;;  %s765_s0 = inlined_call_operand.vmem [shape: f32[16,32], index: 0, kind: input, shape index: {}]   ;;  %s766_s1 = inlined_call_operand.hbm [shape: f32[1,32,128], index: 1, kind: input, shape index: {}]   ;;  %s767_s2 = inlined_call_operand.vmem [shape: f32[1,1,128], index: 2, kind: input, shape index: {}]   ;;  %s768_s3 = inlined_call_operand.hbm [shape: f32[128,128], index: 3, kind: input, shape index: {}]   ;;  %s769_s4 = inlined_call_operand.vmem [shape: f32[1,128], index: 4, kind: input, shape index: {}]   ;;  %s770_s5 = inlined_call_operand.hbm [shape: f32[128,128], index: 5, kind: input, shape index: {}]   ;;  %s771_s6 = inlined_call_operand.vmem [shape: f32[1,128], index: 6, kind: input, shape index: {}]   ;;  %s772_s7 = inlined_call_operand.vmem [shape: f32[1,16,128], index: 7, kind: output, shape index: {}]  }
   0x1   :  { %13 = vsyncpa [#allocation5], 0  ;;  %s645_s24 = smov [#allocation4]   ;;  %s646_s26 = smov [#allocation2]  }
   0x2   :  { %s35_s25 = sshll.u32 %s645_s24, 4  ;;  %s21_s27 = sshll.u32 %s646_s26, 4  ;;  %s36_s25 = int_to_ptr.vmem [resolvable:$true] %s35_s25  ;;  %s690_s27 = int_to_ptr.vmem [resolvable:$true] %s21_s27 }
   0x3   :  { %s575_s30 = scalar_lea.hbm %s768_s3, 2048 }
   0x4   :  { %p576_p0 = scmp.ne.s32.totalorder %s768_s3, %s575_s30  ;;  %p579_p1 = scmp.lt.u32.totalorder %s575_s30, %s768_s3 }
   0x6   :  { %p581_p2 = pnand %p579_p1, %p576_p0 }
   0x8   :  { %584 = shalt.err (!%p581_p2)
}
   0x9   :  { %s585_s12 = scalar_lea.vmem %s36_s25, 2048  ;;  %p590_p4 = scmp.lt.s32.totalorder %s36_s25, %s36_s25 }
   0xa   :  { %p586_p3 = scmp.ne.s32.totalorder %s36_s25, %s585_s12  ;;  %p591_p5 = scmp.lt.s32.totalorder %s585_s12, %s585_s12 }
   0xc   :  { %p592_p6 = por %p591_p5, %p590_p4 }
   0xe   :  { %p593_p7 = pnand %p592_p6, %p586_p3 }
  0x10   :  { %596 = shalt.err (!%p593_p7)
}
  0x11   :  { %s647_s13 = smov 128   ;;  %s648_s14 = smov 8  }
  0x12   :  { %41 = dma.hbm_to_vmem [thread:$0]  %s768_s3, 2048, %s36_s25, [#allocation5], %s647_s13, %s647_s13, %s648_s14  }
  0x13   :  { %s597_s19 = scalar_lea.hbm %s766_s1, 512 }
  0x14   :  { %p598_p8 = scmp.ne.s32.totalorder %s766_s1, %s597_s19  ;;  %p601_p9 = scmp.lt.u32.totalorder %s597_s19, %s766_s1 }
  0x16   :  { %p603_p10 = pnand %p601_p9, %p598_p8 }
  0x18   :  { %606 = shalt.err (!%p603_p10)
}
  0x19   :  { %s607_s24 = scalar_lea.vmem %s690_s27, 512  ;;  %p612_p12 = scmp.lt.s32.totalorder %s690_s27, %s690_s27 }
  0x1a   :  { %p608_p11 = scmp.ne.s32.totalorder %s690_s27, %s607_s24  ;;  %p613_p13 = scmp.lt.s32.totalorder %s607_s24, %s607_s24 }
  0x1c   :  { %p614_p0 = por %p613_p13, %p612_p12 }
  0x1e   :  { %p615_p1 = pnand %p614_p0, %p608_p11 }
  0x20   :  { %618 = shalt.err (!%p615_p1)
}
  0x21   :  { %27 = dma.hbm_to_vmem [thread:$0]  %s766_s1, 512, %s690_s27, [#allocation3], %s647_s13, %s647_s13, %s648_s14  }
  0x22   :  { %s649_s26 = smov [#allocation6]   ;;  %s619_s8 = scalar_lea.hbm %s770_s5, 2048 }
  0x23   :  { %s49_s28 = sshll.u32 %s649_s26, 4  ;;  %p620_p2 = scmp.ne.s32.totalorder %s770_s5, %s619_s8  ;;  %s50_s28 = int_to_ptr.vmem [resolvable:$true] %s49_s28 }
  0x24   :  { %p623_p3 = scmp.lt.u32.totalorder %s619_s8, %s770_s5 }
  0x26   :  { %p625_p4 = pnand %p623_p3, %p620_p2 }
  0x28   :  { %628 = shalt.err (!%p625_p4)
}
  0x29   :  { %s629_s15 = scalar_lea.vmem %s50_s28, 2048  ;;  %p634_p6 = scmp.lt.s32.totalorder %s50_s28, %s50_s28 }
  0x2a   :  { %p630_p5 = scmp.ne.s32.totalorder %s50_s28, %s629_s15  ;;  %p635_p7 = scmp.lt.s32.totalorder %s629_s15, %s629_s15 }
  0x2c   :  { %p636_p8 = por %p635_p7, %p634_p6 }
  0x2e   :  { %p637_p9 = pnand %p636_p8, %p630_p5 }
  0x30   :  { %640 = shalt.err (!%p637_p9)
}
  0x31   :  { %55 = dma.hbm_to_vmem [thread:$0]  %s770_s5, 2048, %s50_s28, [#allocation5], %s647_s13, %s647_s13, %s648_s14  }
  0x32   :  { %641 = dma.done.wait [#allocation3], 512  }
  0x33   :  { %642 = vsyncadd [#allocation3], 4294966784 }
  0x34   :  { %643 = dma.done.wait [#allocation5], 4096  }
  0x35   :  { %644 = vsyncadd [#allocation5], 4294963200  ;;  %vm80_vm0 = vcmask 261120   ;;  %v69_v0 = vld [vmem:[#allocation2] sm:$0xff]  ;;  %v70_v1 = vld [vmem:[#allocation2 + $0x8] sm:$0xff] }
  0x36   :  { %v71_v2 = vld [vmem:[#allocation2 + $0x10] sm:$0xff]  ;;  %v498_v3 = vpack.c.bf16 %v70_v1, %v69_v0  ;;  %v72_v4 = vld [vmem:[#allocation2 + $0x18] sm:$0xff]  ;;  %v67_v5 = vld [vmem:[%s765_s0] sm:$0xff] }
  0x37   :  { %v502_v6 = vpack.c.bf16 %v72_v4, %v71_v2  ;;  %425 = vmatprep.mubr.msk.f32.mxu0 %vm80_vm0, %v67_v5  ;;  %v164_v7 = vld [vmem:[#allocation4] sm:$0xff]  ;;  %v165_v8 = vld [vmem:[#allocation4 + $0x8] sm:$0xff]  ;;  %v166_v9 = vld [vmem:[#allocation4 + $0x10] sm:$0xff] }
  0x38   :  { %499 = vmatprep.subr.bf16.mxu0 %v498_v3  ;;  %v506_v10 = vpack.c.bf16 %v165_v8, %v164_v7  ;;  %v167_v11 = vld [vmem:[#allocation4 + $0x18] sm:$0xff]  ;;  %v168_v13 = vld [vmem:[#allocation4 + $0x20] sm:$0xff]  ;;  %v169_v14 = vld [vmem:[#allocation4 + $0x28] sm:$0xff] }
  0x39   :  { %501 = vmatpush3.bf16.msra.mxu0 %v498_v3  ;;  %v510_v12 = vpack.c.bf16 %v167_v11, %v166_v9  ;;  %v514_v15 = vpack.c.bf16 %v169_v14, %v168_v13  ;;  %v68_v16 = vld [vmem:[%s765_s0 + $0x8] sm:$0xff]  ;;  %v170_v17 = vld [vmem:[#allocation4 + $0x30] sm:$0xff]  ;;  %v171_v18 = vld [vmem:[#allocation4 + $0x38] sm:$0xff] }
  0x3a   :  { %503 = vmatprep.subr.bf16.mxu0 %v502_v6  ;;  %507 = vmatprep.subr.bf16.mxu1 %v506_v10  ;;  %v518_v19 = vpack.c.bf16 %v171_v18, %v170_v17  ;;  %v172_v20 = vld [vmem:[#allocation4 + $0x40] sm:$0xff]  ;;  %v173_v21 = vld [vmem:[#allocation4 + $0x48] sm:$0xff]  ;;  %v174_v23 = vld [vmem:[#allocation4 + $0x50] sm:$0xff] }
  0x3b   :  { %509 = vmatpush3.bf16.msra.mxu1 %v506_v10  ;;  %v522_v22 = vpack.c.bf16 %v173_v21, %v172_v20  ;;  %v175_v24 = vld [vmem:[#allocation4 + $0x58] sm:$0xff]  ;;  %v176_v26 = vld [vmem:[#allocation4 + $0x60] sm:$0xff]  ;;  %v177_v27 = vld [vmem:[#allocation4 + $0x68] sm:$0xff] }
  0x3c   :  { %511 = vmatprep.subr.bf16.mxu1 %v510_v12  ;;  %v526_v25 = vpack.c.bf16 %v175_v24, %v174_v23  ;;  %v530_v28 = vpack.c.bf16 %v177_v27, %v176_v26  ;;  %v178_v29 = vld [vmem:[#allocation4 + $0x70] sm:$0xff]  ;;  %v179_v30 = vld [vmem:[#allocation4 + $0x78] sm:$0xff]  ;;  %v264_v32 = vld [vmem:[#allocation6] sm:$0xff] }
  0x3d   :  { %505 = vmatpush3.bf16.msra.mxu0 %v502_v6  ;;  %v534_v31 = vpack.c.bf16 %v179_v30, %v178_v29  ;;  %v265_v33 = vld [vmem:[#allocation6 + $0x8] sm:$0xff]  ;;  %v266_v34 = vld [vmem:[#allocation6 + $0x10] sm:$0xff]  ;;  %v267_v36 = vld [vmem:[#allocation6 + $0x18] sm:$0xff] }
  0x3e   :  { %v538_v35 = vpack.c.bf16 %v265_v33, %v264_v32  ;;  %v542_v37 = vpack.c.bf16 %v267_v36, %v266_v34  ;;  %v268_v38 = vld [vmem:[#allocation6 + $0x20] sm:$0xff]  ;;  %v269_v39 = vld [vmem:[#allocation6 + $0x28] sm:$0xff]  ;;  %v270_v41 = vld [vmem:[#allocation6 + $0x30] sm:$0xff] }
  0x3f   :  { %513 = vmatpush3.bf16.msra.mxu1 %v510_v12  ;;  %v546_v40 = vpack.c.bf16 %v269_v39, %v268_v38  ;;  %v271_v42 = vld [vmem:[#allocation6 + $0x38] sm:$0xff]  ;;  %v272_v44 = vld [vmem:[#allocation6 + $0x40] sm:$0xff]  ;;  %v273_v45 = vld [vmem:[#allocation6 + $0x48] sm:$0xff] }
  0x40   :  { %426 = vmatmul.mubr.msk.f32.vlgmr.msra.gmra.mrb[0].mxu0 %vm80_vm0, %v68_v16  ;;  %515 = vmatprep.subr.bf16.mxu1 %v514_v15  ;;  %v550_v43 = vpack.c.bf16 %v271_v42, %v270_v41  ;;  %v554_v46 = vpack.c.bf16 %v273_v45, %v272_v44  ;;  %v274_v47 = vld [vmem:[#allocation6 + $0x50] sm:$0xff]  ;;  %v275_v48 = vld [vmem:[#allocation6 + $0x58] sm:$0xff]  ;;  %v276_v50 = vld [vmem:[#allocation6 + $0x60] sm:$0xff] }
  0x41   :  { %539 = vmatprep.subr.bf16.mxu0 %v538_v35  ;;  %v558_v49 = vpack.c.bf16 %v275_v48, %v274_v47  ;;  %v277_v51 = vld [vmem:[#allocation6 + $0x68] sm:$0xff]  ;;  %v370_v53 = vld [vmem:[%s767_s2] ss:$0 sm:$0xff]  ;;  %v278_v60 = vld [vmem:[#allocation6 + $0x70] sm:$0xff] }
  0x42   :  { %541 = vmatpush3.bf16.msra.mxu0 %v538_v35  ;;  %v562_v52 = vpack.c.bf16 %v277_v51, %v276_v50  ;;  %v279_v61 = vld [vmem:[#allocation6 + $0x78] sm:$0xff]  ;;  %v373_v63 = vld [vmem:[%s769_s4] ss:$0 sm:$0xff] }
  0x43   :  { %517 = vmatpush3.bf16.msra.mxu1 %v514_v15  ;;  %543 = vmatprep.subr.bf16.mxu0 %v542_v37  ;;  %v566_v62 = vpack.c.bf16 %v279_v61, %v278_v60  ;;  %v374_v6 = vld [vmem:[%s771_s6] ss:$0 sm:$0xff] }
  0x44   :  { %519 = vmatprep.subr.bf16.mxu1 %v518_v19 }
  0x46   :  { %545 = vmatpush3.bf16.msra.mxu0 %v542_v37 }
  0x47   :  { %521 = vmatpush3.bf16.msra.mxu1 %v518_v19  ;;  %547 = vmatprep.subr.bf16.mxu0 %v546_v40 }
  0x48   :  { %523 = vmatprep.subr.bf16.mxu1 %v522_v22 }
  0x4a   :  { %549 = vmatpush3.bf16.msra.mxu0 %v546_v40 }
  0x4b   :  { %525 = vmatpush3.bf16.msra.mxu1 %v522_v22  ;;  %551 = vmatprep.subr.bf16.mxu0 %v550_v43 }
  0x4c   :  { %527 = vmatprep.subr.bf16.mxu1 %v526_v25 }
  0x4e   :  { %553 = vmatpush3.bf16.msra.mxu0 %v550_v43 }
  0x4f   :  { %529 = vmatpush3.bf16.msra.mxu1 %v526_v25  ;;  %555 = vmatprep.subr.bf16.mxu0 %v554_v46 }
  0x50   :  { %531 = vmatprep.subr.bf16.mxu1 %v530_v28 }
  0x52   :  { %557 = vmatpush3.bf16.msra.mxu0 %v554_v46 }
  0x53   :  { %533 = vmatpush3.bf16.msra.mxu1 %v530_v28  ;;  %559 = vmatprep.subr.bf16.mxu0 %v558_v49 }
  0x54   :  { %535 = vmatprep.subr.bf16.mxu1 %v534_v31 }
  0x56   :  { %561 = vmatpush3.bf16.msra.mxu0 %v558_v49 }
  0x57   :  { %537 = vmatpush3.bf16.msra.mxu1 %v534_v31  ;;  %563 = vmatprep.subr.bf16.mxu0 %v562_v52 }
  0x5a   :  { %565 = vmatpush3.bf16.msra.mxu0 %v562_v52 }
  0x5b   :  { %567 = vmatprep.subr.bf16.mxu0 %v566_v62 }
  0x5e   :  { %569 = vmatpush3.bf16.msra.mxu0 %v566_v62 }
 0x113   :  { %v427_v54 = vpop.f32.mrb[0].mxu0 }
 0x114   :  { %v159_v55 = vadd.f32 %v427_v54, %v370_v53  ;;  %v153_v56 = vpop.f32.mrb[1].mxu0 }
 0x115   :  { %v154_v57 = vadd.f32 %v370_v53, %v153_v56 }
 0x116   :  { %v163_v59 = vmax.f32 %v159_v55, 0.0 }
 0x117   :  { %v162_v58 = vmax.f32 %v154_v57, 0.0 }
 0x119   :  { %460 = vmatprep.mubr.f32.mxu1 %v162_v58 }
 0x11a   :  { %461 = vmatmul.mubr.f32.vlgmr.msra.gmra.mrb[0].mxu1 %v163_v59 }
 0x1ed   :  { %v462_v0 = vpop.f32.mrb[0].mxu1 }
 0x1ee   :  { %v259_v1 = vadd.f32 %v462_v0, %v373_v63  ;;  %v253_v2 = vpop.f32.mrb[1].mxu1 }
 0x1ef   :  { %v254_v3 = vadd.f32 %v373_v63, %v253_v2 }
 0x1f0   :  { %v263_v5 = vmax.f32 %v259_v1, 0.0 }
 0x1f1   :  { %v262_v4 = vmax.f32 %v254_v3, 0.0 }
 0x1f3   :  { %495 = vmatprep.mubr.f32.mxu0 %v262_v4 }
 0x1f4   :  { %496 = vmatmul.mubr.f32.vlgmr.msra.gmra.mrb[2].mxu0 %v263_v5 }
 0x2c7   :  { %v497_v7 = vpop.f32.mrb[2].mxu0 }
 0x2c8   :  { %v359_v8 = vadd.f32 %v497_v7, %v374_v6  ;;  %v353_v9 = vpop.f32.mrb[3].mxu0 }
 0x2c9   :  { %v354_v10 = vadd.f32 %v374_v6, %v353_v9 }
 0x2ca   :  { %363 = vst [vmem:[%s772_s7 + $0x8] sm:$0xff] %v359_v8 }
 0x2cb   :  { %362 = vst [vmem:[%s772_s7] sm:$0xff] %v354_v10 }
 0x2cc   :  { %368 = vsyncpa [#allocation3], 1 }
 0x2cd   :  { %369 = vsyncpa [#allocation5], 1 }

</bundles_post_ra>
